<compile_context>
chip_gen: v5e
topology: v5e:2x2
jax: 0.10.0
libtpu: 0.0.40
codegen_flags: <defaults>
</compile_context>

<pallas_src>
import jax
import jax.numpy as jnp
from jax.experimental import pallas as pl
from jax.experimental.pallas import tpu as pltpu

# DeiT feature-extractor defaults (facebook/deit-base-distilled-patch16-224).
IMAGE_MEAN = (0.5, 0.5, 0.5)
IMAGE_STD = (0.5, 0.5, 0.5)
RESCALE = 1.0 / 255.0

# mean == std and both are channel-uniform, so the whole op folds into one
# FMA with immediates:  (x/255 - 0.5) / 0.5  ==  x * (2/255) - 1.0
_SCALE = RESCALE / IMAGE_STD[0]
_SHIFT = -IMAGE_MEAN[0] / IMAGE_STD[0]

_MAX_ROW_BLOCK = 1024           # 1024 x 1024 f32 out-block = 4 MiB
_LANE_CANDIDATES = (1024, 512, 256, 128)
_VMEM_LIMIT_BYTES = 32 * 1024 * 1024


def _rescale_normalize_kernel(x_ref, o_ref):
    x = x_ref[...]
    if x.dtype != jnp.float32:
        # uint8 pixels -> f32.  The i32 hop is kept for lowering robustness;
        # it is free here (VPU has plenty of slack in a mem-bound kernel).
        x = x.astype(jnp.int32).astype(jnp.float32)
    o_ref[...] = (x * _SCALE + _SHIFT).astype(o_ref.dtype)


def _dimension_semantics(grid_len):
    """PARALLEL everywhere; CORE_PARALLEL on v7x so the 1-D grid is actually
    split across its two TensorCores (plain 'parallel' has ~zero codegen
    effect).  No-op / not evaluated on single-TC chips."""
    kind = ""
    try:
        kind = jax.devices()[0].device_kind.lower()
    except Exception:
        pass
    if grid_len >= 2 and ("v7" in kind or "7x" in kind):
        core_parallel = getattr(pltpu, "CORE_PARALLEL", None)
        if core_parallel is not None:
            return (core_parallel,)
    return (pltpu.PARALLEL,)


def deit_feature_extract(image_nhwc, *, out_dtype=jnp.float32, channels_first=True):
    """DeiT preprocessing (rescale + normalize) via a tiled Pallas kernel.

    image_nhwc: (N, H, W, C) uint8 or float32 pixel values in [0, 255].
    returns:    (N, C, H, W) `out_dtype` pixel_values (HF convention), or
                (N, H, W, C) if channels_first=False (pure-roofline path:
                no transpose pass at all).
    """
    # TODO(synk): DeiT's resize(256, bicubic) + center-crop(224) (PIL ops) has
    # no clean Pallas equivalent; inputs are assumed already at target size.
    assert len(set(IMAGE_MEAN)) == 1 and len(set(IMAGE_STD)) == 1, (
        "constant-folded kernel assumes channel-uniform mean/std; per-channel "
        "values would be passed through SMEM / scalar prefetch instead")

    n, h, w, c = image_nhwc.shape

    if channels_first:
        # One cheap transpose on the narrow *input* dtype (1-4 B/elem) instead
        # of the old 8 B/elem f32 transpose on the output; the kernel output
        # is then already NCHW and needs no further passes.
        src = jnp.transpose(image_nhwc, (0, 3, 1, 2))
        out_dims = (n, c, h, w)
    else:
        # Normalization is channel-independent here, so the NHWC bytes can be
        # streamed in their natural memory order with zero extra passes.
        src = image_nhwc
        out_dims = (n, h, w, c)

    total = n * h * w * c
    flat = src.reshape(total)

    pad = (-total) % 128
    if pad:
        # TODO(synk): pathological sizes only (total not a multiple of 128) —
        # never hit for real image shapes; costs one extra padded copy + slice.
        flat = jnp.pad(flat, (0, pad))
    padded_total = total + pad

    # Lane-dense 2-D slab: pick the widest lane width that divides exactly
    # (1024 for DeiT 224x224x3 at any batch), then fix a large row block and
    # let pl.cdiv + Pallas's masked partial last block handle the remainder.
    lane = next(l for l in _LANE_CANDIDATES if padded_total % l == 0)
    rows = padded_total // lane
    row_block = rows if rows <= _MAX_ROW_BLOCK else _MAX_ROW_BLOCK
    grid = (pl.cdiv(rows, row_block),)

    out2d = pl.pallas_call(
        _rescale_normalize_kernel,
        out_shape=jax.ShapeDtypeStruct((rows, lane), out_dtype),
        grid=grid,
        in_specs=[pl.BlockSpec((row_block, lane), lambda i: (i, 0))],
        out_specs=pl.BlockSpec((row_block, lane), lambda i: (i, 0)),
        compiler_params=pltpu.CompilerParams(
            dimension_semantics=_dimension_semantics(grid[0]),
            vmem_limit_bytes=_VMEM_LIMIT_BYTES),
    )(flat.reshape(rows, lane))

    if pad:
        return out2d.reshape(padded_total)[:total].reshape(out_dims)
    return out2d.reshape(out_dims)


class BERTEncoder:
    """JAX/Pallas port of the reference module's forward pass."""

    def forward(self, token, image):
        # `token` (and the BERT/tokenizer weights) are unused in the reference
        # forward; only the DeiT feature extractor runs.
        return {"pixel_values": deit_feature_extract(image)}


if __name__ == "__main__":
    key = jax.random.PRNGKey(0)
    key_small, key_big = jax.random.split(key)

    # Small synthetic batch: N=2, H=W=16, C=3, uint8 pixels in [0, 255].
    image_u8 = jax.random.randint(
        key_small, (2, 16, 16, 3), 0, 256, dtype=jnp.int32).astype(jnp.uint8)

    enc = BERTEncoder()
    out = enc.forward("a", image_u8)
    pixel_values = jax.block_until_ready(out["pixel_values"])

    # Reference check in plain JAX (HF-style NCHW f32 pixel_values).
    mean = jnp.asarray(IMAGE_MEAN, jnp.float32).reshape(1, 3, 1, 1)
    std = jnp.asarray(IMAGE_STD, jnp.float32).reshape(1, 3, 1, 1)
    xf = jnp.transpose(image_u8.astype(jnp.float32), (0, 3, 1, 2))
    ref = (xf * RESCALE - mean) / std
    assert pixel_values.shape == (2, 3, 16, 16)
    assert pixel_values.dtype == jnp.float32
    assert jnp.allclose(pixel_values, ref, atol=1e-5, rtol=1e-5)

    # float32 input path (pixels already decoded to float) must match too.
    pv_f32in = jax.block_until_ready(
        deit_feature_extract(image_u8.astype(jnp.float32)))
    assert jnp.allclose(pv_f32in, ref, atol=1e-5, rtol=1e-5)

    # NHWC fast path: no transpose pass at all.
    pv_nhwc = jax.block_until_ready(
        deit_feature_extract(image_u8, channels_first=False))
    ref_nhwc = jnp.transpose(ref, (0, 2, 3, 1))
    assert pv_nhwc.shape == (2, 16, 16, 3)
    assert jnp.allclose(pv_nhwc, ref_nhwc, atol=1e-5, rtol=1e-5)

    # bf16 fast-output path (halves the dominant f32 write stream).
    pv_bf16 = jax.block_until_ready(
        deit_feature_extract(image_u8, out_dtype=jnp.bfloat16))
    assert pv_bf16.dtype == jnp.bfloat16
    assert jnp.allclose(pv_bf16.astype(jnp.float32), ref, atol=1e-2, rtol=1e-2)

    # Larger shape exercising the multi-step tiled grid (row_block=1024,
    # grid=2) with a masked partial last block and no pad/slice passes.
    big_u8 = jax.random.randint(
        key_big, (2, 448, 448, 3), 0, 256, dtype=jnp.int32).astype(jnp.uint8)
    pv_big = jax.block_until_ready(deit_feature_extract(big_u8))
    xf_big = jnp.transpose(big_u8.astype(jnp.float32), (0, 3, 1, 2))
    ref_big = (xf_big * RESCALE - mean) / std
    assert pv_big.shape == (2, 3, 448, 448)
    assert jnp.allclose(pv_big, ref_big, atol=1e-5, rtol=1e-5)

    print("KERNEL_OK")
</pallas_src>

<mosaic_0001>
module attributes {stable_mosaic.version = 11 : i64} {
  func.func @_rescale_normalize_kernel(%arg0: i32, %arg1: memref<3x512xi8, #tpu.memory_space<vmem>>, %arg2: memref<3x512xf32, #tpu.memory_space<vmem>>) attributes {dimension_semantics = [#tpu.dimension_semantics<parallel>], iteration_bounds = array<i64: 1>, scalar_prefetch = 0 : i64, scratch_operands = 0 : i64, tpu.core_type = #tpu.core_type<tc>, window_params = [{transform_indices = @transform_0, window_bounds = array<i64: 3, 512>}, {transform_indices = @transform_1, window_bounds = array<i64: 3, 512>}]} {
    %c0 = arith.constant 0 : index
    %c0_0 = arith.constant 0 : index
    %0 = vector.load %arg1[%c0, %c0_0] : memref<3x512xi8, #tpu.memory_space<vmem>>, vector<3x512xi8>
    %1 = arith.extui %0 : vector<3x512xi8> to vector<3x512xi32>
    %2 = arith.sitofp %1 : vector<3x512xi32> to vector<3x512xf32>
    %cst = arith.constant 0.00784313772 : f32
    %3 = vector.broadcast %cst : f32 to vector<3x512xf32>
    %4 = arith.mulf %2, %3 : vector<3x512xf32>
    %cst_1 = arith.constant -1.000000e+00 : f32
    %5 = vector.broadcast %cst_1 : f32 to vector<3x512xf32>
    %6 = arith.addf %4, %5 : vector<3x512xf32>
    %c0_2 = arith.constant 0 : index
    %c0_3 = arith.constant 0 : index
    %7 = vector.load %arg2[%c0_2, %c0_3] : memref<3x512xf32, #tpu.memory_space<vmem>>, vector<3x512xf32>
    tpu.vector_store %arg2[%c0_2, %c0_3], %6 {strides = array<i32>} : memref<3x512xf32, #tpu.memory_space<vmem>>, vector<3x512xf32>,
    return
  }
  func.func @transform_0(%arg0: i32) -> (i32, i32) {
    %c0_i32 = arith.constant 0 : i32
    %c0_i32_0 = arith.constant 0 : i32
    return %arg0, %c0_i32 : i32, i32
  }
  func.func @transform_1(%arg0: i32) -> (i32, i32) {
    %c0_i32 = arith.constant 0 : i32
    %c0_i32_0 = arith.constant 0 : i32
    return %arg0, %c0_i32 : i32, i32
  }
}

</mosaic_0001>

<bundles_post_ra>
// kernel: tpu_custom_call.1
= control target key start
LH: loop header
LB: loop body
LE: loop exit
PB: predicated region body
PF: predicated region fallthrough
CT: control target
= control target key end

     0   :  { %6 = vsyncpa [#allocation3], 0  ;;  %s125_s0 = inlined_call_operand.hbm [shape: u8[3,512], index: 0, kind: input, shape index: {}]   ;;  %s126_s1 = inlined_call_operand.hbm [shape: f32[3,512], index: 1, kind: output, shape index: {}]  }
   0x1   :  { %7 = vsyncpa [#allocation4], 0  ;;  %s13_s8 = sshll.u32 %s125_s0, 4  ;;  %s107_s9 = smov [#allocation2]   ;;  %s14_s8 = int_to_ptr.hbm [resolvable:$true] %s13_s8 }
   0x2   :  { %s15_s10 = sshll.u32 %s107_s9, 4  ;;  %s16_s10 = int_to_ptr.vmem [resolvable:$true] %s15_s10 }
   0x3   :  { %18 = dma.hbm_to_vmem [thread:$0]  %s14_s8, 64, %s16_s10, [#allocation3]  }
   0x4   :  { %103 = dma.done.wait [#allocation3], 64  }
   0x5   :  { %104 = vsyncadd [#allocation3], 4294967232  ;;  %v23_v0 = vld [vmem:[#allocation2] sm:$0xf]  ;;  %s108_s11 = smov [#allocation5]   ;;  %s43_s14 = sshll.u32 %s126_s1, 4  ;;  %s44_s14 = int_to_ptr.hbm [resolvable:$true] %s43_s14 }
   0x6   :  { %v24_v1 = vunpack.c.0.s8 %v23_v0  ;;  %v25_v2 = vunpack.c.1.s8 %v23_v0  ;;  %s41_s12 = sshll.u32 %s108_s11, 4  ;;  %s42_s12 = int_to_ptr.vmem [resolvable:$true] %s41_s12 }
   0x8   :  { %v26_v3 = vand.u32 255, %v24_v1  ;;  %v27_v4 = vand.u32 255, %v25_v2 }
   0xa   :  { %v28_v5 = vcvt.s32.f32 %v26_v3  ;;  %v29_v6 = vcvt.s32.f32 %v27_v4 }
   0xc   :  { %v30_v7 = vmul.f32 0.007843138, %v28_v5  ;;  %v31_v8 = vmul.f32 0.007843138, %v29_v6 }
   0xe   :  { %v32_v9 = vadd.f32 -1.0, %v30_v7  ;;  %v33_v10 = vadd.f32 -1.0, %v31_v8 }
  0x10   :  { %34 = vst [vmem:[#allocation5] sm:$0x77] %v32_v9 }
  0x11   :  { %35 = vst [vmem:[#allocation5 + $0x8] sm:$0x77] %v33_v10 }
  0x12   :  { %46 = dma.vmem_to_hbm [thread:$0]  %s42_s12, 256, %s44_s14, [#allocation4]  }
  0x13   :  { %105 = dma.done.wait [#allocation4], 256  }
  0x14   :  { %106 = vsyncadd [#allocation4], 4294967040 }
  0x15   :  { %51 = vsyncpa [#allocation3], 1 }
  0x16   :  { %52 = vsyncpa [#allocation4], 1 }

</bundles_post_ra>
